<compile_context>
chip_gen: v7x
topology: tpu7x:2x2x1
jax: 0.10.0
libtpu: 0.0.40
codegen_flags: <defaults>
</compile_context>

<pallas_src>
from functools import lru_cache

import jax
import jax.numpy as jnp
from jax.experimental import pallas as pl
from jax.experimental.pallas import tpu as pltpu

# Explicit VMEM budgets (feedback: do not rely on defaults tuned for 128 MiB).
_VMEM_MM = 32 * 1024 * 1024
_VMEM_CONV = 48 * 1024 * 1024
_VMEM_EW = 32 * 1024 * 1024


# ----------------------------------------------------------------------------
# Small helpers
# ----------------------------------------------------------------------------
def _round_up(x, m):
    return ((x + m - 1) // m) * m


def _largest_divisor_leq(n, cap):
    cap = int(max(1, min(n, cap)))
    for d in range(cap, 0, -1):
        if n % d == 0:
            return d
    return n


def _tile_rows(m, cap=512):
    """Row (sublane) tiling: tile must be a multiple of 8 or the full dim."""
    if m <= cap:
        return m, m
    for d in (512, 256, 128, 64, 32, 16, 8):
        if d <= cap and m % d == 0:
            return m, d
    mp = _round_up(m, cap)
    return mp, cap


def _tile_cols(n, cap=1024):
    """Col (lane) tiling: tile must be a multiple of 128 or the full dim."""
    if n <= cap:
        return n, n
    for d in (1024, 512, 256, 128):
        if d <= cap and n % d == 0:
            return n, d
    np_ = _round_up(n, 512)
    return np_, 512


def _apply_act(acc, act):
    if act == "relu":
        return jnp.maximum(acc, 0.0)
    if act == "leaky_relu":
        return jnp.where(acc >= 0.0, acc, 0.01 * acc)
    if act == "sigmoid":
        return jax.nn.sigmoid(acc)
    return acc


# ----------------------------------------------------------------------------
# Pallas kernel 1: tiled matmul  act(A @ B + bias)
# ----------------------------------------------------------------------------
@lru_cache(maxsize=None)
def _build_matmul(Mp, K, Np, tm, tn, act, has_bias):
    def kernel(*refs):
        if has_bias:
            a_ref, b_ref, bias_ref, o_ref = refs
        else:
            a_ref, b_ref, o_ref = refs
        acc = jnp.dot(a_ref[...], b_ref[...], preferred_element_type=jnp.float32)
        if has_bias:
            acc = acc + bias_ref[...]
        o_ref[...] = _apply_act(acc, act)

    in_specs = [
        pl.BlockSpec((tm, K), lambda i, j: (i, 0)),
        pl.BlockSpec((K, tn), lambda i, j: (0, j)),
    ]
    if has_bias:
        in_specs.append(pl.BlockSpec((1, tn), lambda i, j: (0, j)))

    fn = pl.pallas_call(
        kernel,
        out_shape=jax.ShapeDtypeStruct((Mp, Np), jnp.float32),
        grid=(Mp // tm, Np // tn),
        in_specs=in_specs,
        out_specs=pl.BlockSpec((tm, tn), lambda i, j: (i, j)),
        compiler_params=pltpu.CompilerParams(
            dimension_semantics=("parallel", "parallel"),
            vmem_limit_bytes=_VMEM_MM),
    )
    return jax.jit(fn)


def pallas_matmul(a, b, bias=None, act="none"):
    """act(a @ b + bias); a:(M,K), b:(K,N), bias:(N,)/(1,N) or None. f32 output."""
    a = jnp.asarray(a)
    b = jnp.asarray(b)
    M, K = a.shape
    K2, N = b.shape
    assert K == K2
    a = a.astype(jnp.bfloat16)
    b = b.astype(jnp.bfloat16)
    if K < 8:                                   # tiny contraction dim safeguard
        a = jnp.pad(a, ((0, 0), (0, 8 - K)))
        b = jnp.pad(b, ((0, 8 - K), (0, 0)))
        K = 8
    if M < 8:
        Mp, tm = 8, 8
    else:
        Mp, tm = _tile_rows(M)
    Np, tn = _tile_cols(N)
    if Mp != M:
        a = jnp.pad(a, ((0, Mp - M), (0, 0)))
    if Np != N:
        b = jnp.pad(b, ((0, 0), (0, Np - N)))
    has_bias = bias is not None
    args = [a, b]
    if has_bias:
        bias2 = jnp.asarray(bias, jnp.float32).reshape(1, -1)
        if Np != N:
            bias2 = jnp.pad(bias2, ((0, 0), (0, Np - N)))
        args.append(bias2)
    out = _build_matmul(Mp, K, Np, tm, tn, act, has_bias)(*args)
    if Mp != M or Np != N:
        out = out[:M, :N]
    return out


# ----------------------------------------------------------------------------
# Pallas kernel 2: fused stride-1 KxK conv (NHWC), taps accumulated in-kernel
# ----------------------------------------------------------------------------
@lru_cache(maxsize=None)
def _build_conv(N, Hp, Wp, Cin, Ho, Wo, Cout, kh, kw, TH, act):
    def kernel(x_ref, w_ref, b_ref, o_ref):
        row0 = pl.program_id(1) * TH
        acc = jnp.zeros((TH * Wo, Cout), jnp.float32)
        for i in range(kh):
            band = x_ref[:, pl.ds(row0 + i, TH), :, :]          # (1, TH, Wp, Cin)
            for j in range(kw):
                patch = band[:, :, j:j + Wo, :].reshape(TH * Wo, Cin)
                acc = acc + jnp.dot(patch, w_ref[i * kw + j],
                                    preferred_element_type=jnp.float32)
        acc = _apply_act(acc + b_ref[...], act)
        o_ref[...] = acc.reshape(1, TH, Wo, Cout)

    fn = pl.pallas_call(
        kernel,
        out_shape=jax.ShapeDtypeStruct((N, Ho, Wo, Cout), jnp.float32),
        grid=(N, Ho // TH),
        in_specs=[
            pl.BlockSpec((1, Hp, Wp, Cin), lambda n, r: (n, 0, 0, 0)),
            pl.BlockSpec((kh * kw, Cin, Cout), lambda n, r: (0, 0, 0)),
            pl.BlockSpec((1, Cout), lambda n, r: (0, 0)),
        ],
        out_specs=pl.BlockSpec((1, TH, Wo, Cout), lambda n, r: (n, r, 0, 0)),
        compiler_params=pltpu.CompilerParams(
            dimension_semantics=("parallel", "parallel"),
            vmem_limit_bytes=_VMEM_CONV),
    )
    return jax.jit(fn)


def conv2d_s1_nhwc(x_nhwc, p, act="none"):
    """Stride-1 conv on NHWC input with pre-packed taps p={'taps','b','kh','kw','pad'}."""
    N, H, W, Cin = x_nhwc.shape
    kh, kw, pad = p["kh"], p["kw"], p["pad"]
    taps, bias = p["taps"], p["b"]
    cin_p = taps.shape[1]
    cpad = cin_p - Cin
    if pad or cpad:
        x_nhwc = jnp.pad(x_nhwc, ((0, 0), (pad, pad), (pad, pad), (0, cpad)))
    Hp, Wp = H + 2 * pad, W + 2 * pad
    Ho, Wo = Hp - kh + 1, Wp - kw + 1
    Cout = taps.shape[-1]
    row_budget = max(1, (2 << 20) // max(Wo * Cout * 4, 1))
    TH = _largest_divisor_leq(Ho, row_budget)
    fn = _build_conv(N, Hp, Wp, cin_p, Ho, Wo, Cout, kh, kw, TH, act)
    return fn(x_nhwc.astype(jnp.bfloat16), taps, bias)


def conv2d_fwd(p, x, act="none"):
    """NCHW stride-1 conv via the fused Pallas NHWC kernel."""
    y = conv2d_s1_nhwc(jnp.transpose(x, (0, 2, 3, 1)), p, act)
    return jnp.transpose(y, (0, 3, 1, 2))


# ----------------------------------------------------------------------------
# Pallas kernel 3: circular temporal conv1d (k=3), taps accumulated in-kernel
# ----------------------------------------------------------------------------
@lru_cache(maxsize=None)
def _build_tconv(T, Pp, C, Cout, TP):
    def kernel(x_ref, w_ref, b_ref, o_ref):
        acc = jnp.zeros((T * TP, Cout), jnp.float32)
        for k in range(3):
            seg = x_ref[pl.ds(k, T), :, :]                      # (T, TP, C)
            acc = acc + jnp.dot(seg.reshape(T * TP, C), w_ref[k],
                                preferred_element_type=jnp.float32)
        acc = acc + b_ref[...]
        o_ref[...] = acc.reshape(T, TP, Cout)

    fn = pl.pallas_call(
        kernel,
        out_shape=jax.ShapeDtypeStruct((T, Pp, Cout), jnp.float32),
        grid=(Pp // TP,),
        in_specs=[
            pl.BlockSpec((T + 2, TP, C), lambda p: (0, p, 0)),
            pl.BlockSpec((3, C, Cout), lambda p: (0, 0, 0)),
            pl.BlockSpec((1, Cout), lambda p: (0, 0)),
        ],
        out_specs=pl.BlockSpec((T, TP, Cout), lambda p: (0, p, 0)),
        compiler_params=pltpu.CompilerParams(
            dimension_semantics=("parallel",),
            vmem_limit_bytes=_VMEM_CONV),
    )
    return jax.jit(fn)


def conv1d_temporal(y, w_taps, bias):
    """Circular temporal conv (k=3).  y:(T, P, C) -> (T, P, Cout)."""
    T, P, C = y.shape
    Cout = w_taps.shape[-1]
    per_row = (T + 2) * C * 2 + T * Cout * 4
    cap = max(8, (4 << 20) // max(per_row, 1))
    if P <= cap:
        Pp, TP = P, P
    else:
        d = _largest_divisor_leq(P, cap)
        if d % 8 == 0:
            Pp, TP = P, d
        else:
            TP = max(8, (min(cap, 256) // 8) * 8)
            Pp = _round_up(P, TP)
    if Pp != P:
        y = jnp.pad(y, ((0, 0), (0, Pp - P), (0, 0)))
    y_ext = jnp.concatenate([y[T - 1:T], y, y[0:1]], axis=0).astype(jnp.bfloat16)
    out = _build_tconv(T, Pp, C, Cout, TP)(y_ext, w_taps, bias)
    if Pp != P:
        out = out[:, :P, :]
    return out


# ----------------------------------------------------------------------------
# Pallas kernel 4: FiLM modulation  x + w*x + b  (row-tiled)
# ----------------------------------------------------------------------------
@lru_cache(maxsize=None)
def _build_film(M, L, tm):
    def kernel(x_ref, w_ref, b_ref, o_ref):
        xv = x_ref[...]
        o_ref[...] = xv + w_ref[...] * xv + b_ref[...]

    fn = pl.pallas_call(
        kernel,
        out_shape=jax.ShapeDtypeStruct((M, L), jnp.float32),
        grid=(M // tm,),
        in_specs=[
            pl.BlockSpec((tm, L), lambda i: (i, 0)),
            pl.BlockSpec((tm, 1), lambda i: (i, 0)),
            pl.BlockSpec((tm, 1), lambda i: (i, 0)),
        ],
        out_specs=pl.BlockSpec((tm, L), lambda i: (i, 0)),
        compiler_params=pltpu.CompilerParams(
            dimension_semantics=("parallel",),
            vmem_limit_bytes=_VMEM_EW),
    )
    return jax.jit(fn)


def film_apply(x, w, b):
    """x:(N,C,H,W), w,b:(N,C)  ->  x + w*x + b (per frame/channel)."""
    N, C, H, W = x.shape
    M, L = N * C, H * W
    cap = max(8, (4 << 20) // max(L * 4, 1))
    if M <= cap:
        tm = M
    else:
        tm = None
        d = (min(M, cap) // 8) * 8
        while d >= 8:
            if M % d == 0:
                tm = d
                break
            d -= 8
        if tm is None:
            tm = M
    x2 = x.reshape(M, L).astype(jnp.float32)
    wc = jnp.asarray(w, jnp.float32).reshape(M, 1)
    bc = jnp.asarray(b, jnp.float32).reshape(M, 1)
    out = _build_film(M, L, tm)(x2, wc, bc)
    return out.reshape(N, C, H, W)


# ----------------------------------------------------------------------------
# Layer wrappers
# ----------------------------------------------------------------------------
def linear_fwd(p, x, act="none"):
    return pallas_matmul(x, p["wp"], p["bp"], act=act)


def conv2_1d_fwd(p, x):
    """Conv2_1d: spatial conv (+ReLU) then circular temporal conv1d (tcp=True)."""
    if p["stride"] == 1:
        y = conv2d_s1_nhwc(jnp.transpose(x, (0, 2, 3, 1)), p["spatial"], act="relu")
    else:  # 2x2 / stride-2 spatial conv as a space-to-depth matmul (no duplication)
        N, C, H, W = x.shape
        k = p["ks"]
        Ho, Wo = H // k, W // k
        xm = x.reshape(N, C, Ho, k, Wo, k).transpose(0, 2, 4, 1, 3, 5)
        xm = xm.reshape(N * Ho * Wo, C * k * k)
        cout = p["b2p"].shape[0]
        y = pallas_matmul(xm, p["w2p"], p["b2p"], act="relu").reshape(N, Ho, Wo, cout)
    T, Ho, Wo, C2 = y.shape
    out = conv1d_temporal(y.reshape(T, Ho * Wo, C2), p["w1taps"], p["b1p"])
    return out.reshape(T, Ho, Wo, -1).transpose(0, 3, 1, 2)


def convT2_1d_fwd(p, x):
    """ConvTranspose2_1d: 2x2/str2 transpose conv (+ReLU) then temporal conv1d."""
    T, Cin, H, W = x.shape
    cout = p["cout"]
    xm = jnp.transpose(x, (0, 2, 3, 1)).reshape(T * H * W, Cin)
    y = pallas_matmul(xm, p["wtp"], p["btp"], act="relu")
    y = y.reshape(T, H, W, cout, 2, 2).transpose(0, 1, 4, 2, 5, 3)
    y = y.reshape(T, 2 * H, 2 * W, cout)
    out = conv1d_temporal(y.reshape(T, 4 * H * W, cout), p["w1taps"], p["b1p"])
    return out.reshape(T, 2 * H, 2 * W, -1).transpose(0, 3, 1, 2)


# ----------------------------------------------------------------------------
# Plain-JAX helpers (FFT, complex, resize, norms)
# ----------------------------------------------------------------------------
def _to_complex(x):
    return x[..., 0] + 1j * x[..., 1]


def _to_real(c):
    return jnp.stack([jnp.real(c), jnp.imag(c)], axis=-1)


def fft2c(x):
    c = _to_complex(x)
    c = jnp.fft.ifftshift(c, axes=(-2, -1))
    c = jnp.fft.fft2(c, norm="ortho")
    c = jnp.fft.fftshift(c, axes=(-2, -1))
    return _to_real(c)


def ifft2c(x):
    c = _to_complex(x)
    c = jnp.fft.ifftshift(c, axes=(-2, -1))
    c = jnp.fft.ifft2(c, norm="ortho")
    c = jnp.fft.fftshift(c, axes=(-2, -1))
    return _to_real(c)


def complex_mul(a, b):
    re = a[..., 0] * b[..., 0] - a[..., 1] * b[..., 1]
    im = a[..., 0] * b[..., 1] + a[..., 1] * b[..., 0]
    return jnp.stack([re, im], axis=-1)


def complex_conj(a):
    return jnp.stack([a[..., 0], -a[..., 1]], axis=-1)


def sens_reduce(x, sens):
    img = ifft2c(x)
    return complex_mul(img, complex_conj(sens)).sum(axis=2, keepdims=True)


def sens_expand(x, sens):
    return fft2c(complex_mul(x, sens))


def bilinear_resize_torch(x, out_h, out_w):
    """F.interpolate(mode='bilinear', align_corners=False, antialias=False)."""
    _, C, H, W = x.shape

    def coords(out_size, in_size):
        scale = in_size / out_size
        src = (jnp.arange(out_size, dtype=jnp.float32) + 0.5) * scale - 0.5
        src = jnp.maximum(src, 0.0)
        i0 = jnp.clip(jnp.floor(src).astype(jnp.int32), 0, in_size - 1)
        i1 = jnp.clip(i0 + 1, 0, in_size - 1)
        frac = src - i0.astype(jnp.float32)
        return i0, i1, frac

    y0, y1, fy = coords(out_h, H)
    x0, x1, fx = coords(out_w, W)
    r0 = x[:, :, y0, :]
    r1 = x[:, :, y1, :]
    top = r0[:, :, :, x0] * (1 - fx)[None, None, None, :] + r0[:, :, :, x1] * fx[None, None, None, :]
    bot = r1[:, :, :, x0] * (1 - fx)[None, None, None, :] + r1[:, :, :, x1] * fx[None, None, None, :]
    return top * (1 - fy)[None, None, :, None] + bot * fy[None, None, :, None]


def layernorm(x, g, b, eps=1e-5):
    mu = x.mean(axis=-1, keepdims=True)
    var = ((x - mu) ** 2).mean(axis=-1, keepdims=True)
    return (x - mu) / jnp.sqrt(var + eps) * g + b


def norm_fn(x):
    bsz = x.shape[0]
    flat = x.reshape(bsz, -1)
    mean = flat.mean(axis=1).reshape(bsz, 1, 1, 1)
    std = jnp.std(flat, axis=1, ddof=1).reshape(bsz, 1, 1, 1)
    return (x - mean) / (std + 1e-6), mean, std


# ----------------------------------------------------------------------------
# Module forwards
# ----------------------------------------------------------------------------
def mlp_fwd(p, x):
    h = linear_fwd(p["fc1"], x)
    h = jax.nn.gelu(h, approximate=False)
    return linear_fwd(p["fc2"], h)


def prompts_block_fwd(p, kspace_idx, acc_idx):
    ke = p["kspace_prior"][kspace_idx]
    ae = p["acc_prior"][acc_idx]
    emb = jnp.concatenate([ke, ae], axis=-1)
    return mlp_fwd(p["mlp"], emb)


def flim_fwd(p, x, z):
    bt = x.shape[0]
    x_c = x.mean(axis=(2, 3))
    zz = jnp.concatenate([x_c, jnp.tile(z, (bt, 1))], axis=-1)
    w_z = linear_fwd(p["w_lin"], zz)
    b_z = linear_fwd(p["b_lin"], zz)
    z_info = (w_z + b_z).mean(axis=0, keepdims=True)
    out = film_apply(x, w_z, b_z)
    return out, z_info


def prompt_block_fwd(p, x):
    B, C, H, W = x.shape
    pr = bilinear_resize_torch(p["prompt"], H, W)
    x_p = jnp.concatenate([x, jnp.broadcast_to(pr, (B, C, H, W))], axis=1)
    x_prompt = conv2_1d_fwd(p["conv1"], x_p) + conv2d_fwd(p["conv"], x)
    pe = conv2_1d_fwd(p["conv2"], x_p)
    pe = pe.mean(axis=(2, 3)).mean(axis=0, keepdims=True)
    return x_prompt, pe


def ta_se_fwd(p, x, hh):
    t, C, h, w = x.shape
    x1 = conv2_1d_fwd(p["conv_x"], x)
    h1 = conv2_1d_fwd(p["conv_h"], hh)
    y = jax.nn.leaky_relu(x1 + h1, 0.01)
    y_1 = y.mean(axis=(2, 3))                              # (t, C)
    corrs = pallas_matmul(y_1, y_1.T) / (C ** 0.5)
    corrs = jax.nn.softmax(corrs + 1e-6, axis=-1)
    v = y.reshape(t, -1)
    out = pallas_matmul(corrs, v).reshape(t, C, h, w)
    out_1 = out.mean(axis=(2, 3))
    hmid = linear_fwd(p["fc1"], out_1, act="relu")
    c_out = linear_fwd(p["fc2"], hmid, act="sigmoid").reshape(t, C, 1, 1)
    return out * c_out + conv2d_fwd(p["conv"], y)


def data_consistency(img, k0, mask, sens):
    """img:(b,t,1,h,w,2), k0 complex:(b,t,coils,h,w), sens:(b,1,coils,h,w,2)."""
    k = sens_expand(img, sens)
    kc = _to_complex(k)
    m = mask[:, :, None, :, :]
    out = (1 - m) * kc + m * k0
    red = sens_reduce(_to_real(out), sens)[:, :, 0]
    return red


def cascade_forward(p, ref_kspace, x, net, mask, sens, prompt_embed):
    b, _, h, w, _ = x.shape
    prompts, prompts_img = [], []
    net = dict(net)

    x = x.transpose(0, 1, 4, 2, 3).reshape(b, -1, h, w)
    x, mean, std = norm_fn(x)
    x = x.reshape(b, 2, -1, h, w).transpose(2, 0, 1, 3, 4)   # (t, b, 2, h, w)
    t = x.shape[0]
    x = x.astype(jnp.float32)

    x0 = conv2d_fwd(p["conv0"], x.reshape(-1, 2, h, w))
    x00, prompt_tmp = flim_fwd(p["flim1"], x0, prompt_embed)
    net["x0"] = ta_se_fwd(p["d_ts1"], x00, net["x0"])
    net["x0"] = net["x0"] + conv2d_fwd(p["conv11"], x0)
    x1 = conv2_1d_fwd(p["d_conv1"], net["x0"])
    prompts.append(prompt_tmp)

    x01, prompt_tmp = flim_fwd(p["flim2"], x1, prompt_embed)
    net["x1"] = ta_se_fwd(p["d_ts2"], x01, net["x1"])
    net["x1"] = net["x1"] + conv2d_fwd(p["conv21"], x1)
    x2 = conv2_1d_fwd(p["d_conv2"], net["x1"])
    prompts.append(prompt_tmp)

    x02, prompt_tmp = flim_fwd(p["flim3"], x2, prompt_embed)
    net["x2"] = ta_se_fwd(p["bn"], x02, net["x2"])
    net["x2"] = net["x2"] + conv2d_fwd(p["conv31"], x2)
    x2 = conv2_1d_fwd(p["d_conv3"], net["x2"])
    prompts.append(prompt_tmp)

    x3 = conv2_1d_fwd(p["u_conv2"], x2)
    x03, prompt_tmp = flim_fwd(p["flim4"], x3, prompt_embed)
    net["x3"] = ta_se_fwd(p["u_ts2"], x03, net["x3"])
    net["x3"], prompt_x3 = prompt_block_fwd(p["prompt2"], net["x3"])
    net["x3"] = net["x3"] + conv2d_fwd(p["conv41"], x3)
    net["x3"] = jnp.concatenate([net["x3"], net["x1"]], axis=1)
    net["x3"] = conv2_1d_fwd(p["conv2"], net["x3"])
    net["x1"] = net["x3"]
    prompts.append(prompt_tmp)
    prompts_img.append(prompt_x3)

    x4 = convT2_1d_fwd(p["u_conv1"], net["x3"])
    x04, prompt_tmp = flim_fwd(p["flim5"], x4, prompt_embed)
    net["x4"] = ta_se_fwd(p["u_ts1"], x04, net["x4"])
    net["x4"], prompt_x4 = prompt_block_fwd(p["prompt1"], net["x4"])
    net["x4"] = net["x4"] + conv2d_fwd(p["conv51"], x4)
    net["x4"] = jnp.concatenate([net["x4"], net["x0"]], axis=1)
    net["x4"] = conv2_1d_fwd(p["conv1"], net["x4"])
    net["x0"] = net["x4"]
    prompts.append(prompt_tmp)
    prompts_img.append(prompt_x4)

    x01f = conv2d_fwd(p["conv"], net["x4"])                  # (t*b, 2, h, w)
    xr = x.reshape(-1, 2, h, w) + x01f
    xr = xr.reshape(-1, b, 2, h, w).transpose(1, 0, 2, 3, 4).reshape(b, -1, h, w)
    xr = xr * std + mean
    xr = xr.reshape(b, -1, 2, h, w).transpose(0, 1, 3, 4, 2)  # (b, t, h, w, 2)
    x_out = data_consistency(xr[:, :, None], ref_kspace, mask, sens)
    x_out = x_out.transpose(0, 4, 2, 3, 1)                    # (b, 2, h, w, t)
    return x_out, net, prompts, prompts_img


def classifier_fwd(p, x, y):
    x = layernorm(x, p["ln_g"], p["ln_b"])
    y = layernorm(y, p["ln_g"], p["ln_b"])
    x = x.mean(axis=0, keepdims=True)
    y = y.mean(axis=0, keepdims=True)
    xy = jnp.concatenate([x, y], axis=-1)
    h = mlp_fwd(p["mlp"], xy)
    return linear_fwd(p["lin_kspace"], h), linear_fwd(p["lin_acc"], h)


def upcmr_forward(params, ref_kspace, mask, sens_maps, kspace_idx, acc_idx):
    b, t, coils, h, w = ref_kspace.shape
    chans = params["chans"]
    kspace_real = _to_real(ref_kspace)                       # view_as_real
    sens = sens_maps[:, None]                                # (b,1,coils,h,w,2)
    x_ref = sens_reduce(kspace_real, sens)[:, :, 0]          # (b,t,h,w,2)
    x = x_ref.transpose(0, 4, 2, 3, 1)                       # (b,2,h,w,t)

    prompt_embed = prompts_block_fwd(params["prompts"], kspace_idx, acc_idx)

    net = {
        "x0": jnp.zeros((t * b, chans, h, w), jnp.float32),
        "x4": jnp.zeros((t * b, chans, h, w), jnp.float32),
        "x1": jnp.zeros((t * b, chans, h // 2, w // 2), jnp.float32),
        "x2": jnp.zeros((t * b, chans, h // 2, w // 2), jnp.float32),
        "x3": jnp.zeros((t * b, chans, h // 2, w // 2), jnp.float32),
    }

    prompt_embeds, prompt_embeds_img = [], []
    for cp in params["cascades"]:
        x, net, prompts, prompts_img = cascade_forward(
            cp, ref_kspace, x, net, mask, sens, prompt_embed)
        prompt_embeds.extend(prompts)
        prompt_embeds_img.extend(prompts_img)

    pe = jnp.concatenate(prompt_embeds, axis=0)
    pei = jnp.concatenate(prompt_embeds_img, axis=0)
    k_cls, a_cls = classifier_fwd(params["classifier"], pe, pei)
    return x.transpose(0, 4, 2, 3, 1), k_cls, a_cls


# ----------------------------------------------------------------------------
# Deterministic parameter initialization (synthetic; weights pre-packed bf16)
# ----------------------------------------------------------------------------
W_SCALE = 0.05


class KeyGen:
    def __init__(self, seed=0):
        self.key = jax.random.PRNGKey(seed)

    def __call__(self):
        self.key, sub = jax.random.split(self.key)
        return sub


def init_linear(kg, in_dim, out_dim, bias=True):
    w = jax.random.normal(kg(), (out_dim, in_dim), jnp.float32) * W_SCALE
    p = {"wp": jnp.asarray(w.T, jnp.bfloat16)}
    p["bp"] = (jax.random.normal(kg(), (out_dim,), jnp.float32) * W_SCALE) if bias else None
    return p


def pack_conv2d(w, b, pad):
    cout, cin, kh, kw = w.shape
    cin_p = max(cin, 8)                                      # MXU-friendly min K
    taps = jnp.transpose(w, (2, 3, 1, 0)).reshape(kh * kw, cin, cout)
    if cin_p != cin:
        taps = jnp.pad(taps, ((0, 0), (0, cin_p - cin), (0, 0)))
    return {"taps": taps.astype(jnp.bfloat16),
            "b": jnp.asarray(b, jnp.float32).reshape(1, cout),
            "kh": kh, "kw": kw, "pad": pad}


def init_conv2d(kg, cin, cout, k, stride=1, pad=0):
    assert stride == 1
    w = jax.random.normal(kg(), (cout, cin, k, k), jnp.float32) * W_SCALE
    b = jax.random.normal(kg(), (cout,), jnp.float32) * W_SCALE
    return pack_conv2d(w, b, pad)


def init_conv2_1d(kg, cin, cout, k, stride, pad):
    w2 = jax.random.normal(kg(), (cout, cin, k, k), jnp.float32) * W_SCALE
    b2 = jax.random.normal(kg(), (cout,), jnp.float32) * W_SCALE
    w1 = jax.random.normal(kg(), (cout, cout, 3), jnp.float32) * W_SCALE
    b1 = jax.random.normal(kg(), (cout,), jnp.float32) * W_SCALE
    p = {"stride": stride}
    if stride == 1:
        p["spatial"] = pack_conv2d(w2, b2, pad)
    else:                                                    # 2x2 stride-2, pad 0
        p["w2p"] = jnp.asarray(w2.reshape(cout, cin * k * k).T, jnp.bfloat16)
        p["b2p"] = jnp.asarray(b2, jnp.float32)
        p["ks"] = k
    p["w1taps"] = jnp.asarray(jnp.transpose(w1, (2, 1, 0)), jnp.bfloat16)  # (3,cin,cout)
    p["b1p"] = jnp.asarray(b1, jnp.float32).reshape(1, cout)
    return p


def init_convT2_1d(kg, cin, cout):
    wt = jax.random.normal(kg(), (cin, cout, 2, 2), jnp.float32) * W_SCALE
    bt = jax.random.normal(kg(), (cout,), jnp.float32) * W_SCALE
    w1 = jax.random.normal(kg(), (cout, cout, 3), jnp.float32) * W_SCALE
    b1 = jax.random.normal(kg(), (cout,), jnp.float32) * W_SCALE
    return {"wtp": jnp.asarray(wt.reshape(cin, cout * 4), jnp.bfloat16),
            "btp": jnp.repeat(jnp.asarray(bt, jnp.float32), 4),
            "cout": cout,
            "w1taps": jnp.asarray(jnp.transpose(w1, (2, 1, 0)), jnp.bfloat16),
            "b1p": jnp.asarray(b1, jnp.float32).reshape(1, cout)}


def init_mlp(kg, in_dim, hid, out):
    return {"fc1": init_linear(kg, in_dim, hid), "fc2": init_linear(kg, hid, out)}


def init_flim(kg, dim):
    return {"w_lin": init_linear(kg, 2 * dim, dim), "b_lin": init_linear(kg, 2 * dim, dim)}


def init_prompt_block(kg, dim, prompt_size):
    return {"prompt": jax.random.normal(kg(), (1, dim, prompt_size, prompt_size), jnp.float32) * 0.1,
            "conv1": init_conv2_1d(kg, 2 * dim, dim, 3, 1, 1),
            "conv2": init_conv2_1d(kg, 2 * dim, dim, 3, 1, 1),
            "conv": init_conv2d(kg, dim, dim, 1, 1, 0)}


def init_ta_se(kg, chans):
    return {"conv_x": init_conv2_1d(kg, chans, chans, 3, 1, 1),
            "conv_h": init_conv2_1d(kg, chans, chans, 3, 1, 1),
            "conv": init_conv2d(kg, chans, chans, 1, 1, 0),
            "fc1": init_linear(kg, chans, 2 * chans, bias=False),
            "fc2": init_linear(kg, 2 * chans, chans, bias=False)}


def init_unet_block(kg, chans):
    p = {"prompt1": init_prompt_block(kg, chans, 64),
         "prompt2": init_prompt_block(kg, chans, 32)}
    for i in range(1, 6):
        p[f"flim{i}"] = init_flim(kg, chans)
    p["d_ts1"] = init_ta_se(kg, chans)
    p["d_conv1"] = init_conv2_1d(kg, chans, chans, 2, 2, 0)     # default (3,2,2)/(1,2,2)
    p["d_ts2"] = init_ta_se(kg, chans)
    p["d_conv2"] = init_conv2_1d(kg, chans, chans, 3, 1, 1)
    p["bn"] = init_ta_se(kg, chans)
    p["d_conv3"] = init_conv2_1d(kg, chans, chans, 3, 1, 1)
    p["u_conv2"] = init_conv2_1d(kg, chans, chans, 3, 1, 1)
    p["u_ts2"] = init_ta_se(kg, chans)
    p["u_conv1"] = init_convT2_1d(kg, chans, chans)
    p["u_ts1"] = init_ta_se(kg, chans)
    for name in ("conv11", "conv21", "conv31", "conv41", "conv51"):
        p[name] = init_conv2d(kg, chans, chans, 1, 1, 0)
    p["conv2"] = init_conv2_1d(kg, 2 * chans, chans, 3, 1, 1)
    p["conv1"] = init_conv2_1d(kg, 2 * chans, chans, 3, 1, 1)
    p["conv"] = init_conv2d(kg, chans, 2, 5, 1, 2)
    p["conv0"] = init_conv2d(kg, 2, chans, 3, 1, 1)
    return p


def init_upcmr(kg, num_cascades, chans, kspace_num, acc_num):
    return {
        "chans": chans,
        "prompts": {
            "kspace_prior": jax.random.normal(kg(), (kspace_num, chans), jnp.float32) * W_SCALE,
            "acc_prior": jax.random.normal(kg(), (acc_num, chans), jnp.float32) * W_SCALE,
            "mlp": init_mlp(kg, 2 * chans, 2 * chans, chans),
        },
        "cascades": [init_unet_block(kg, chans) for _ in range(num_cascades)],
        "classifier": {
            "ln_g": jnp.ones((chans,), jnp.float32),
            "ln_b": jnp.zeros((chans,), jnp.float32),
            "mlp": init_mlp(kg, 2 * chans, chans, chans),
            "lin_kspace": init_linear(kg, chans, 3),
            "lin_acc": init_linear(kg, chans, 6),
        },
    }


# ----------------------------------------------------------------------------
if __name__ == "__main__":
    B, T, COILS, H, W = 1, 4, 2, 16, 16
    CHANS = 8
    NUM_CASCADES = 2

    key = jax.random.PRNGKey(0)
    k1, k2, k3, k4 = jax.random.split(key, 4)
    ref_kspace = (jax.random.normal(k1, (B, T, COILS, H, W), jnp.float32)
                  + 1j * jax.random.normal(k2, (B, T, COILS, H, W), jnp.float32)).astype(jnp.complex64)
    mask = (jax.random.uniform(k3, (B, T, H, W)) > 0.5).astype(jnp.float32)
    sens_maps = jax.random.normal(k4, (B, COILS, H, W, 2), jnp.float32) * 0.5
    kspace_idx = jnp.array([1], jnp.int32)
    acc_idx = jnp.array([2], jnp.int32)

    kg = KeyGen(0)
    params = init_upcmr(kg, NUM_CASCADES, CHANS, kspace_num=3, acc_num=6)

    out, k_cls, a_cls = upcmr_forward(params, ref_kspace, mask, sens_maps, kspace_idx, acc_idx)
    jax.block_until_ready((out, k_cls, a_cls))

    assert out.shape == (B, T, H, W, 2), out.shape
    assert k_cls.shape == (1, 3), k_cls.shape
    assert a_cls.shape == (1, 6), a_cls.shape
    assert bool(jnp.all(jnp.isfinite(out)))
    assert bool(jnp.all(jnp.isfinite(k_cls))) and bool(jnp.all(jnp.isfinite(a_cls)))
    print("KERNEL_OK")
</pallas_src>

<mosaic_0001>
module attributes {stable_mosaic.version = 11 : i64} {
  func.func @kernel(%arg0: i32, %arg1: i32, %arg2: memref<8x16xbf16, #tpu.memory_space<vmem>>, %arg3: memref<16x16xbf16, #tpu.memory_space<vmem>>, %arg4: memref<1x16xf32, #tpu.memory_space<vmem>>, %arg5: memref<8x16xf32, #tpu.memory_space<vmem>>) attributes {dimension_semantics = [#tpu.dimension_semantics<parallel>, #tpu.dimension_semantics<parallel>], iteration_bounds = array<i64: 1, 1>, scalar_prefetch = 0 : i64, scratch_operands = 0 : i64, tpu.core_type = #tpu.core_type<tc>, window_params = [{transform_indices = @transform_0, window_bounds = array<i64: 8, 16>}, {transform_indices = @transform_1, window_bounds = array<i64: 16, 16>}, {transform_indices = @transform_2, window_bounds = array<i64: 1, 16>}, {transform_indices = @transform_3, window_bounds = array<i64: 8, 16>}]} {
    %c0 = arith.constant 0 : index
    %c0_0 = arith.constant 0 : index
    %0 = vector.load %arg2[%c0, %c0_0] : memref<8x16xbf16, #tpu.memory_space<vmem>>, vector<8x16xbf16>
    %c0_1 = arith.constant 0 : index
    %c0_2 = arith.constant 0 : index
    %1 = vector.load %arg3[%c0_1, %c0_2] : memref<16x16xbf16, #tpu.memory_space<vmem>>, vector<16x16xbf16>
    %cst = arith.constant dense<0.000000e+00> : vector<8x16xf32>
    %2 = tpu.matmul %0, %1, %cst {dimension_numbers = #tpu.dot_dimension_numbers<[1], [0], [0], [1], [0, 0, 1, 1], [], []>} : vector<8x16xbf16>, vector<16x16xbf16>, vector<8x16xf32> -> vector<8x16xf32>
    %c0_3 = arith.constant 0 : index
    %c0_4 = arith.constant 0 : index
    %3 = vector.load %arg4[%c0_3, %c0_4] : memref<1x16xf32, #tpu.memory_space<vmem>>, vector<1x16xf32>
    %4 = vector.broadcast %3 : vector<1x16xf32> to vector<8x16xf32>
    %5 = arith.addf %2, %4 : vector<8x16xf32>
    %c0_5 = arith.constant 0 : index
    %c0_6 = arith.constant 0 : index
    %6 = vector.load %arg5[%c0_5, %c0_6] : memref<8x16xf32, #tpu.memory_space<vmem>>, vector<8x16xf32>
    tpu.vector_store %arg5[%c0_5, %c0_6], %5 {strides = array<i32>} : memref<8x16xf32, #tpu.memory_space<vmem>>, vector<8x16xf32>,
    return
  }
  func.func @transform_0(%arg0: i32, %arg1: i32) -> (i32, i32) {
    %c0_i32 = arith.constant 0 : i32
    %c0_i32_0 = arith.constant 0 : i32
    return %arg0, %c0_i32 : i32, i32
  }
  func.func @transform_1(%arg0: i32, %arg1: i32) -> (i32, i32) {
    %c0_i32 = arith.constant 0 : i32
    %c0_i32_0 = arith.constant 0 : i32
    return %c0_i32, %arg1 : i32, i32
  }
  func.func @transform_2(%arg0: i32, %arg1: i32) -> (i32, i32) {
    %c0_i32 = arith.constant 0 : i32
    %c0_i32_0 = arith.constant 0 : i32
    return %c0_i32, %arg1 : i32, i32
  }
  func.func @transform_3(%arg0: i32, %arg1: i32) -> (i32, i32) {
    %c0_i32 = arith.constant 0 : i32
    return %arg0, %arg1 : i32, i32
  }
}

</mosaic_0001>

<bundles_post_ra>
// kernel: tpu_custom_call.1
= control target key start
LH: loop header
LB: loop body
LE: loop exit
PB: predicated region body
PF: predicated region fallthrough
CT: control target
= control target key end

     0   :  { %8 = vsyncpa [#allocation3], 0  ;;  %s283_s0 = inlined_call_operand.hbm [shape: bf16[8,16], index: 0, kind: input, shape index: {}]   ;;  %s284_s1 = inlined_call_operand.hbm [shape: bf16[16,16], index: 1, kind: input, shape index: {}]   ;;  %s285_s2 = inlined_call_operand.vmem [shape: f32[1,16], index: 2, kind: input, shape index: {}]   ;;  %s286_s3 = inlined_call_operand.hbm [shape: f32[8,16], index: 3, kind: output, shape index: {}]  }
   0x1   :  { %9 = vsyncpa [#allocation6], 0 }
   0x2   :  { %10 = vsyncpa [#allocation4], 0  ;;  %s210_s12 = smov [#allocation2]   ;;  %s211_s14 = smov [#allocation5]  }
   0x3   :  { %s17_s13 = sshll.u32 %s210_s12, 4  ;;  %s26_s15 = sshll.u32 %s211_s14, 4  ;;  %s18_s13 = int_to_ptr.vmem [resolvable:$true] %s17_s13  ;;  %s237_s15 = int_to_ptr.vmem [resolvable:$true] %s26_s15 }
   0x4   :  { %s138_s18 = scalar_lea.hbm %s283_s0, 64 }
   0x5   :  { %p139_p0 = scmp.ne.s32.totalorder %s283_s0, %s138_s18  ;;  %p142_p1 = scmp.lt.u32.totalorder %s138_s18, %s283_s0 }
   0x7   :  { %p144_p2 = pnand %p142_p1, %p139_p0 }
   0x9   :  { %147 = shalt.err (!%p144_p2)
}
   0xa   :  { %s148_s23 = scalar_lea.vmem %s18_s13, 64  ;;  %p153_p4 = scmp.lt.s32.totalorder %s18_s13, %s18_s13 }
   0xb   :  { %p149_p3 = scmp.ne.s32.totalorder %s18_s13, %s148_s23  ;;  %p154_p5 = scmp.lt.s32.totalorder %s148_s23, %s148_s23 }
   0xd   :  { %p155_p6 = por %p154_p5, %p153_p4 }
   0xf   :  { %p156_p7 = pnand %p155_p6, %p149_p3 }
  0x11   :  { %159 = shalt.err (!%p156_p7)
}
  0x12   :  { %20 = dma.hbm_to_vmem [thread:$0]  %s283_s0, 64, %s18_s13, [#allocation3]  }
  0x13   :  { %s160_s28 = scalar_lea.hbm %s284_s1, 128 }
  0x14   :  { %p161_p8 = scmp.ne.s32.totalorder %s284_s1, %s160_s28  ;;  %p164_p9 = scmp.lt.u32.totalorder %s160_s28, %s284_s1 }
  0x16   :  { %p166_p10 = pnand %p164_p9, %p161_p8 }
  0x18   :  { %169 = shalt.err (!%p166_p10)
}
  0x19   :  { %s170_s6 = scalar_lea.vmem %s237_s15, 128  ;;  %p175_p12 = scmp.lt.s32.totalorder %s237_s15, %s237_s15 }
  0x1a   :  { %p171_p11 = scmp.ne.s32.totalorder %s237_s15, %s170_s6  ;;  %p176_p13 = scmp.lt.s32.totalorder %s170_s6, %s170_s6 }
  0x1c   :  { %p177_p0 = por %p176_p13, %p175_p12 }
  0x1e   :  { %p178_p1 = pnand %p177_p0, %p171_p11 }
  0x20   :  { %181 = shalt.err (!%p178_p1)
}
  0x21   :  { %s212_s0 = smov 64   ;;  %s213_s7 = smov 4  }
  0x22   :  { %32 = dma.hbm_to_vmem [thread:$0]  %s284_s1, 128, %s237_s15, [#allocation6], %s212_s0, %s212_s0, %s213_s7  }
  0x23   :  { %204 = dma.done.wait [#allocation3], 64  }
  0x24   :  { %205 = vsyncadd [#allocation3], 4294967232 }
  0x25   :  { %206 = dma.done.wait [#allocation6], 128  }
  0x26   :  { %207 = vsyncadd [#allocation6], 4294967168  ;;  %v214_v0 = vmov 0.0   ;;  %vm215_vm0 = vmmov 0   ;;  %v137_v1 = vld [vmem:[#allocation5] sm:$0xff]   ;;  %vm58_vm1 = vcmask 130048  }
  0x27   :  { %124 = vmatprep.subr.bf16.mxu0 %v214_v0  ;;  %126 = vmatprep.mubr.msk.bf16.mxu0 %vm215_vm0, %v214_v0  ;;  %v42_v2 = vld [vmem:[#allocation2] sm:$0xf]  ;;  %s216_s12 = smov [#allocation7]  }
  0x28   :  { %125 = vmatpush3.bf16.msra.mxu0 %v137_v1  ;;  %v119_v3 = vld [vmem:[%s285_s2] ss:$0 sm:$0xff]  ;;  %s109_s13 = sshll.u32 %s216_s12, 4  ;;  %s110_s13 = int_to_ptr.vmem [resolvable:$true] %s109_s13 }
  0x29   :  { %s182_s1 = scalar_lea.vmem %s110_s13, 128  ;;  %p187_p3 = scmp.lt.s32.totalorder %s110_s13, %s110_s13 }
  0x2a   :  { %p183_p2 = scmp.ne.s32.totalorder %s110_s13, %s182_s1  ;;  %p188_p4 = scmp.lt.s32.totalorder %s182_s1, %s182_s1 }
  0x2b   :  { %127 = vmatmul.mubr.msk.bf16.vlgmr.msra.gmra.mrb[0].mxu0 %vm58_vm1, %v42_v2 }
  0x2c   :  { %p189_p5 = por %p188_p4, %p187_p3 }
  0x2e   :  { %p190_p6 = pnand %p189_p5, %p183_p2 }
  0xfe   :  { %v96_v4 = vpop.f32.mrb[0].mxu0 }
  0xff   :  { %v97_v5 = vadd.f32 %v119_v3, %v96_v4  ;;  %v128_v6 = vpop.f32.mrb[1].mxu0 }
 0x100   :  { %v99_v7 = vpop.f32.mrb[2].mxu0 }
 0x101   :  { %102 = vst.msk [vmem:[#allocation7] sm:$0xff] %vm58_vm1, %v97_v5  ;;  %v129_v8 = vpop.f32.mrb[3].mxu0 }
 0x102   :  { %193 = shalt.err (!%p190_p6)
}
 0x103   :  { %s194_s2 = scalar_lea.hbm %s286_s3, 128 }
 0x104   :  { %p195_p7 = scmp.ne.s32.totalorder %s286_s3, %s194_s2  ;;  %p198_p8 = scmp.lt.u32.totalorder %s194_s2, %s286_s3 }
 0x106   :  { %p200_p9 = pnand %p198_p8, %p195_p7 }
 0x108   :  { %203 = shalt.err (!%p200_p9)
}
 0x109   :  { %112 = dma.vmem_to_hbm [thread:$0]  %s110_s13, 128, %s286_s3, [#allocation4]  }
 0x10a   :  { %208 = dma.done.wait [#allocation4], 128  }
 0x10b   :  { %209 = vsyncadd [#allocation4], 4294967168 }
 0x10c   :  { %116 = vsyncpa [#allocation3], 1 }
 0x10d   :  { %117 = vsyncpa [#allocation6], 1 }
 0x10e   :  { %118 = vsyncpa [#allocation4], 1 }

</bundles_post_ra>
